<compile_context>
chip_gen: v7x
topology: tpu7x:2x2x1
jax: 0.10.0
libtpu: 0.0.40
codegen_flags: <defaults>
</compile_context>

<pallas_src>
import jax
import jax.numpy as jnp
from jax.experimental import pallas as pl
from jax.experimental.pallas import tpu as pltpu

INPUT_DIM = 20
HIDDEN_DIM = 200
OUTPUT_DIM = 20

# Lane-aligned padded sizes for the hidden/output feature dims.
HID_PAD = 256   # 200 -> 256
OUT_PAD = 128   # 20  -> 128 (unmasked 128-lane stores)


def _round_up(n, m):
    return ((n + m - 1) // m) * m


def _pick_tile_b(B):
    """Batch-tile size: big enough to amortize step overhead, >=2 steps for v7x."""
    if B < 256:
        # bf16 packs 16 sublanes per vreg -> round tiny batches to 16.
        return _round_up(max(B, 16), 16)
    # >= 2 grid steps (v7x has 2 TensorCores sharing the "parallel" axis),
    # multiple of 128 rows (full MXU M tiles), capped at 1024 (v5e scoped VMEM).
    return min(1024, _round_up(pl.cdiv(B, 2), 128))


def _mlp_kernel(x_ref,
                w1_ref, b1_ref,
                w2_ref, b2_ref,
                w3_ref, b3_ref,
                w4_ref, b4_ref,
                w5_ref, b5_ref,
                o_ref):
    # x arrives at logical width (K = 20) in f32; cast to bf16 here so the
    # MXU runs its bf16 path. Accumulation / bias / ReLU stay f32 (VPU work
    # hidden under the MXU slot).
    x = x_ref[...].astype(jnp.bfloat16)

    h = jnp.dot(x, w1_ref[...], preferred_element_type=jnp.float32)
    h = jnp.maximum(h + b1_ref[...], 0.0)

    h = jnp.dot(h.astype(jnp.bfloat16), w2_ref[...],
                preferred_element_type=jnp.float32)
    h = jnp.maximum(h + b2_ref[...], 0.0)

    h = jnp.dot(h.astype(jnp.bfloat16), w3_ref[...],
                preferred_element_type=jnp.float32)
    h = jnp.maximum(h + b3_ref[...], 0.0)

    h = jnp.dot(h.astype(jnp.bfloat16), w4_ref[...],
                preferred_element_type=jnp.float32)
    h = jnp.maximum(h + b4_ref[...], 0.0)

    out = jnp.dot(h.astype(jnp.bfloat16), w5_ref[...],
                  preferred_element_type=jnp.float32)
    # bf16 writeback on a full 128-lane slab -> unmasked vst, half the HBM bytes
    # of an f32 output. Logical 20 columns are sliced outside the kernel.
    o_ref[...] = (out + b5_ref[...]).astype(o_ref.dtype)


def init_params(key):
    """nn.Linear-style uniform(-1/sqrt(fan_in), 1/sqrt(fan_in)) init.

    Weights stored pre-transposed as [in_features, out_features] so y = x @ W + b.
    """
    dims = [(INPUT_DIM, HIDDEN_DIM),
            (HIDDEN_DIM, HIDDEN_DIM),
            (HIDDEN_DIM, HIDDEN_DIM),
            (HIDDEN_DIM, HIDDEN_DIM),
            (HIDDEN_DIM, OUTPUT_DIM)]
    params = {}
    for i, (fan_in, fan_out) in enumerate(dims, start=1):
        key, kw, kb = jax.random.split(key, 3)
        bound = 1.0 / jnp.sqrt(jnp.float32(fan_in))
        params[f"w{i}"] = jax.random.uniform(
            kw, (fan_in, fan_out), jnp.float32, minval=-bound, maxval=bound)
        params[f"b{i}"] = jax.random.uniform(
            kb, (1, fan_out), jnp.float32, minval=-bound, maxval=bound)
    return params


def prepare_padded_params(params):
    """Zero-pad feature dims to lane-aligned shapes; weights -> bf16, biases f32.

    w1 keeps its logical 20 input rows (full-array-dim block, so no (8,128)
    violation) to match the unpadded x feed.
    """
    def pad2(a, rows, cols):
        return jnp.pad(a, ((0, rows - a.shape[0]), (0, cols - a.shape[1])))

    return {
        "w1": pad2(params["w1"], INPUT_DIM, HID_PAD).astype(jnp.bfloat16),
        "w2": pad2(params["w2"], HID_PAD, HID_PAD).astype(jnp.bfloat16),
        "w3": pad2(params["w3"], HID_PAD, HID_PAD).astype(jnp.bfloat16),
        "w4": pad2(params["w4"], HID_PAD, HID_PAD).astype(jnp.bfloat16),
        "w5": pad2(params["w5"], HID_PAD, OUT_PAD).astype(jnp.bfloat16),
        "b1": pad2(params["b1"], 1, HID_PAD),
        "b2": pad2(params["b2"], 1, HID_PAD),
        "b3": pad2(params["b3"], 1, HID_PAD),
        "b4": pad2(params["b4"], 1, HID_PAD),
        "b5": pad2(params["b5"], 1, OUT_PAD),
    }


def four_layer_nn_forward(x, padded_params):
    """x: [B, INPUT_DIM] float32 -> [B, OUTPUT_DIM] float32."""
    B = x.shape[0]
    tile_b = _pick_tile_b(B)
    bp = _round_up(B, tile_b)

    # Only the batch dim is padded (and only when needed); the 20-wide feature
    # dim is passed through at logical width — no host-side pad/cast pass.
    xp = x if bp == B else jnp.pad(x, ((0, bp - B), (0, 0)))

    def const_spec(shape):
        # Constant block index -> DMA'd once, revisited (VMEM-resident) weights.
        return pl.BlockSpec(shape, lambda i: (0, 0))

    out_padded = pl.pallas_call(
        _mlp_kernel,
        out_shape=jax.ShapeDtypeStruct((bp, OUT_PAD), jnp.bfloat16),
        grid=(bp // tile_b,),
        in_specs=[
            pl.BlockSpec((tile_b, INPUT_DIM), lambda i: (i, 0)),   # x batch tile
            const_spec((INPUT_DIM, HID_PAD)), const_spec((1, HID_PAD)),
            const_spec((HID_PAD, HID_PAD)),   const_spec((1, HID_PAD)),
            const_spec((HID_PAD, HID_PAD)),   const_spec((1, HID_PAD)),
            const_spec((HID_PAD, HID_PAD)),   const_spec((1, HID_PAD)),
            const_spec((HID_PAD, OUT_PAD)),   const_spec((1, OUT_PAD)),
        ],
        out_specs=pl.BlockSpec((tile_b, OUT_PAD), lambda i: (i, 0)),
        compiler_params=pltpu.CompilerParams(
            dimension_semantics=("parallel",)),
    )(
        xp,
        padded_params["w1"], padded_params["b1"],
        padded_params["w2"], padded_params["b2"],
        padded_params["w3"], padded_params["b3"],
        padded_params["w4"], padded_params["b4"],
        padded_params["w5"], padded_params["b5"],
    )
    # Small post-kernel slice/cast over a bf16 buffer (half the old traffic).
    return out_padded[:B, :OUTPUT_DIM].astype(jnp.float32)


def reference_forward_f32(x, params):
    h = x
    for i in range(1, 5):
        h = jnp.maximum(h @ params[f"w{i}"] + params[f"b{i}"], 0.0)
    return h @ params["w5"] + params["b5"]


def reference_forward_bf16(x, params):
    # Mirrors the kernel's numerics: bf16 matmul inputs, f32 accumulate/bias/ReLU.
    h = x.astype(jnp.bfloat16)
    for i in range(1, 5):
        w = params[f"w{i}"].astype(jnp.bfloat16)
        h = jnp.dot(h, w, preferred_element_type=jnp.float32) + params[f"b{i}"]
        h = jnp.maximum(h, 0.0).astype(jnp.bfloat16)
    w = params["w5"].astype(jnp.bfloat16)
    return jnp.dot(h, w, preferred_element_type=jnp.float32) + params["b5"]


if __name__ == "__main__":
    key = jax.random.PRNGKey(0)
    key, kx = jax.random.split(key)

    params = init_params(key)
    padded_params = prepare_padded_params(params)

    # ---- Small-batch path (B=8 -> one 16-row tile). ----
    B = 8
    x = jax.random.normal(kx, (B, INPUT_DIM), jnp.float32)
    out = jax.block_until_ready(four_layer_nn_forward(x, padded_params))
    assert out.shape == (B, OUTPUT_DIM)

    # Tight check vs. a reference with the kernel's bf16/f32 numerics
    # (kernel additionally rounds the final output to bf16; rtol covers it).
    ref_q = reference_forward_bf16(x, params)
    assert jnp.allclose(out, ref_q, atol=1e-2, rtol=1e-2), \
        f"max err vs bf16 ref: {jnp.max(jnp.abs(out - ref_q))}"

    # Loose sanity check vs. the pure-f32 PyTorch-equivalent reference.
    ref_f32 = reference_forward_f32(x, params)
    assert jnp.allclose(out, ref_f32, atol=5e-2, rtol=5e-2), \
        f"max err vs f32 ref: {jnp.max(jnp.abs(out - ref_f32))}"

    # ---- Multi-tile path (B=512 -> two 256-row tiles, exercises the grid). ----
    key, kx2 = jax.random.split(key)
    B2 = 512
    x2 = jax.random.normal(kx2, (B2, INPUT_DIM), jnp.float32)
    out2 = jax.block_until_ready(four_layer_nn_forward(x2, padded_params))
    assert out2.shape == (B2, OUTPUT_DIM)
    ref2 = reference_forward_bf16(x2, params)
    assert jnp.allclose(out2, ref2, atol=1e-2, rtol=1e-2), \
        f"max err vs bf16 ref (B=512): {jnp.max(jnp.abs(out2 - ref2))}"

    print("KERNEL_OK")
</pallas_src>

<mosaic_0001>
module attributes {stable_mosaic.version = 11 : i64} {
  func.func @_mlp_kernel(%arg0: i32, %arg1: memref<16x20xf32, #tpu.memory_space<vmem>>, %arg2: memref<20x256xbf16, #tpu.memory_space<vmem>>, %arg3: memref<1x256xf32, #tpu.memory_space<vmem>>, %arg4: memref<256x256xbf16, #tpu.memory_space<vmem>>, %arg5: memref<1x256xf32, #tpu.memory_space<vmem>>, %arg6: memref<256x256xbf16, #tpu.memory_space<vmem>>, %arg7: memref<1x256xf32, #tpu.memory_space<vmem>>, %arg8: memref<256x256xbf16, #tpu.memory_space<vmem>>, %arg9: memref<1x256xf32, #tpu.memory_space<vmem>>, %arg10: memref<256x128xbf16, #tpu.memory_space<vmem>>, %arg11: memref<1x128xf32, #tpu.memory_space<vmem>>, %arg12: memref<16x128xbf16, #tpu.memory_space<vmem>>) attributes {dimension_semantics = [#tpu.dimension_semantics<parallel>], iteration_bounds = array<i64: 1>, scalar_prefetch = 0 : i64, scratch_operands = 0 : i64, tpu.core_type = #tpu.core_type<tc>, window_params = [{transform_indices = @transform_0, window_bounds = array<i64: 16, 20>}, {pipeline_mode = #tpu.pipeline_mode<synchronous>, transform_indices = @transform_1, window_bounds = array<i64: 20, 256>}, {pipeline_mode = #tpu.pipeline_mode<synchronous>, transform_indices = @transform_2, window_bounds = array<i64: 1, 256>}, {pipeline_mode = #tpu.pipeline_mode<synchronous>, transform_indices = @transform_3, window_bounds = array<i64: 256, 256>}, {pipeline_mode = #tpu.pipeline_mode<synchronous>, transform_indices = @transform_4, window_bounds = array<i64: 1, 256>}, {pipeline_mode = #tpu.pipeline_mode<synchronous>, transform_indices = @transform_5, window_bounds = array<i64: 256, 256>}, {pipeline_mode = #tpu.pipeline_mode<synchronous>, transform_indices = @transform_6, window_bounds = array<i64: 1, 256>}, {pipeline_mode = #tpu.pipeline_mode<synchronous>, transform_indices = @transform_7, window_bounds = array<i64: 256, 256>}, {pipeline_mode = #tpu.pipeline_mode<synchronous>, transform_indices = @transform_8, window_bounds = array<i64: 1, 256>}, {pipeline_mode = #tpu.pipeline_mode<synchronous>, transform_indices = @transform_9, window_bounds = array<i64: 256, 128>}, {pipeline_mode = #tpu.pipeline_mode<synchronous>, transform_indices = @transform_10, window_bounds = array<i64: 1, 128>}, {transform_indices = @transform_11, window_bounds = array<i64: 16, 128>}]} {
    %c0 = arith.constant 0 : index
    %c0_0 = arith.constant 0 : index
    %0 = vector.load %arg1[%c0, %c0_0] : memref<16x20xf32, #tpu.memory_space<vmem>>, vector<16x20xf32>
    %1 = arith.truncf %0 : vector<16x20xf32> to vector<16x20xbf16>
    %c0_1 = arith.constant 0 : index
    %c0_2 = arith.constant 0 : index
    %2 = vector.load %arg2[%c0_1, %c0_2] : memref<20x256xbf16, #tpu.memory_space<vmem>>, vector<20x256xbf16>
    %cst = arith.constant dense<0.000000e+00> : vector<16x256xf32>
    %3 = tpu.matmul %1, %2, %cst {dimension_numbers = #tpu.dot_dimension_numbers<[1], [0], [0], [1], [0, 0, 1, 1], [], []>} : vector<16x20xbf16>, vector<20x256xbf16>, vector<16x256xf32> -> vector<16x256xf32>
    %c0_3 = arith.constant 0 : index
    %c0_4 = arith.constant 0 : index
    %4 = vector.load %arg3[%c0_3, %c0_4] : memref<1x256xf32, #tpu.memory_space<vmem>>, vector<1x256xf32>
    %5 = vector.broadcast %4 : vector<1x256xf32> to vector<16x256xf32>
    %6 = arith.addf %3, %5 : vector<16x256xf32>
    %cst_5 = arith.constant 0.000000e+00 : f32
    %7 = vector.broadcast %cst_5 : f32 to vector<16x256xf32>
    %8 = arith.maximumf %6, %7 : vector<16x256xf32>
    %9 = arith.truncf %8 : vector<16x256xf32> to vector<16x256xbf16>
    %c0_6 = arith.constant 0 : index
    %c0_7 = arith.constant 0 : index
    %10 = vector.load %arg4[%c0_6, %c0_7] : memref<256x256xbf16, #tpu.memory_space<vmem>>, vector<256x256xbf16>
    %cst_8 = arith.constant dense<0.000000e+00> : vector<16x256xf32>
    %11 = tpu.matmul %9, %10, %cst_8 {dimension_numbers = #tpu.dot_dimension_numbers<[1], [0], [0], [1], [0, 0, 1, 1], [], []>} : vector<16x256xbf16>, vector<256x256xbf16>, vector<16x256xf32> -> vector<16x256xf32>
    %c0_9 = arith.constant 0 : index
    %c0_10 = arith.constant 0 : index
    %12 = vector.load %arg5[%c0_9, %c0_10] : memref<1x256xf32, #tpu.memory_space<vmem>>, vector<1x256xf32>
    %13 = vector.broadcast %12 : vector<1x256xf32> to vector<16x256xf32>
    %14 = arith.addf %11, %13 : vector<16x256xf32>
    %cst_11 = arith.constant 0.000000e+00 : f32
    %15 = vector.broadcast %cst_11 : f32 to vector<16x256xf32>
    %16 = arith.maximumf %14, %15 : vector<16x256xf32>
    %17 = arith.truncf %16 : vector<16x256xf32> to vector<16x256xbf16>
    %c0_12 = arith.constant 0 : index
    %c0_13 = arith.constant 0 : index
    %18 = vector.load %arg6[%c0_12, %c0_13] : memref<256x256xbf16, #tpu.memory_space<vmem>>, vector<256x256xbf16>
    %cst_14 = arith.constant dense<0.000000e+00> : vector<16x256xf32>
    %19 = tpu.matmul %17, %18, %cst_14 {dimension_numbers = #tpu.dot_dimension_numbers<[1], [0], [0], [1], [0, 0, 1, 1], [], []>} : vector<16x256xbf16>, vector<256x256xbf16>, vector<16x256xf32> -> vector<16x256xf32>
    %c0_15 = arith.constant 0 : index
    %c0_16 = arith.constant 0 : index
    %20 = vector.load %arg7[%c0_15, %c0_16] : memref<1x256xf32, #tpu.memory_space<vmem>>, vector<1x256xf32>
    %21 = vector.broadcast %20 : vector<1x256xf32> to vector<16x256xf32>
    %22 = arith.addf %19, %21 : vector<16x256xf32>
    %cst_17 = arith.constant 0.000000e+00 : f32
    %23 = vector.broadcast %cst_17 : f32 to vector<16x256xf32>
    %24 = arith.maximumf %22, %23 : vector<16x256xf32>
    %25 = arith.truncf %24 : vector<16x256xf32> to vector<16x256xbf16>
    %c0_18 = arith.constant 0 : index
    %c0_19 = arith.constant 0 : index
    %26 = vector.load %arg8[%c0_18, %c0_19] : memref<256x256xbf16, #tpu.memory_space<vmem>>, vector<256x256xbf16>
    %cst_20 = arith.constant dense<0.000000e+00> : vector<16x256xf32>
    %27 = tpu.matmul %25, %26, %cst_20 {dimension_numbers = #tpu.dot_dimension_numbers<[1], [0], [0], [1], [0, 0, 1, 1], [], []>} : vector<16x256xbf16>, vector<256x256xbf16>, vector<16x256xf32> -> vector<16x256xf32>
    %c0_21 = arith.constant 0 : index
    %c0_22 = arith.constant 0 : index
    %28 = vector.load %arg9[%c0_21, %c0_22] : memref<1x256xf32, #tpu.memory_space<vmem>>, vector<1x256xf32>
    %29 = vector.broadcast %28 : vector<1x256xf32> to vector<16x256xf32>
    %30 = arith.addf %27, %29 : vector<16x256xf32>
    %cst_23 = arith.constant 0.000000e+00 : f32
    %31 = vector.broadcast %cst_23 : f32 to vector<16x256xf32>
    %32 = arith.maximumf %30, %31 : vector<16x256xf32>
    %33 = arith.truncf %32 : vector<16x256xf32> to vector<16x256xbf16>
    %c0_24 = arith.constant 0 : index
    %c0_25 = arith.constant 0 : index
    %34 = vector.load %arg10[%c0_24, %c0_25] : memref<256x128xbf16, #tpu.memory_space<vmem>>, vector<256x128xbf16>
    %cst_26 = arith.constant dense<0.000000e+00> : vector<16x128xf32>
    %35 = tpu.matmul %33, %34, %cst_26 {dimension_numbers = #tpu.dot_dimension_numbers<[1], [0], [0], [1], [0, 0, 1, 1], [], []>} : vector<16x256xbf16>, vector<256x128xbf16>, vector<16x128xf32> -> vector<16x128xf32>
    %c0_27 = arith.constant 0 : index
    %c0_28 = arith.constant 0 : index
    %36 = vector.load %arg11[%c0_27, %c0_28] : memref<1x128xf32, #tpu.memory_space<vmem>>, vector<1x128xf32>
    %37 = vector.broadcast %36 : vector<1x128xf32> to vector<16x128xf32>
    %38 = arith.addf %35, %37 : vector<16x128xf32>
    %39 = arith.truncf %38 : vector<16x128xf32> to vector<16x128xbf16>
    %c0_29 = arith.constant 0 : index
    %c0_30 = arith.constant 0 : index
    %40 = vector.load %arg12[%c0_29, %c0_30] : memref<16x128xbf16, #tpu.memory_space<vmem>>, vector<16x128xbf16>
    tpu.vector_store %arg12[%c0_29, %c0_30], %39 {strides = array<i32>} : memref<16x128xbf16, #tpu.memory_space<vmem>>, vector<16x128xbf16>,
    return
  }
  func.func @transform_0(%arg0: i32) -> (i32, i32) {
    %c0_i32 = arith.constant 0 : i32
    %c0_i32_0 = arith.constant 0 : i32
    return %arg0, %c0_i32 : i32, i32
  }
  func.func @transform_1(%arg0: i32) -> (i32, i32) {
    %c0_i32 = arith.constant 0 : i32
    %c0_i32_0 = arith.constant 0 : i32
    %c0_i32_1 = arith.constant 0 : i32
    return %c0_i32, %c0_i32_0 : i32, i32
  }
  func.func @transform_2(%arg0: i32) -> (i32, i32) {
    %c0_i32 = arith.constant 0 : i32
    %c0_i32_0 = arith.constant 0 : i32
    %c0_i32_1 = arith.constant 0 : i32
    return %c0_i32, %c0_i32_0 : i32, i32
  }
  func.func @transform_3(%arg0: i32) -> (i32, i32) {
    %c0_i32 = arith.constant 0 : i32
    %c0_i32_0 = arith.constant 0 : i32
    %c0_i32_1 = arith.constant 0 : i32
    return %c0_i32, %c0_i32_0 : i32, i32
  }
  func.func @transform_4(%arg0: i32) -> (i32, i32) {
    %c0_i32 = arith.constant 0 : i32
    %c0_i32_0 = arith.constant 0 : i32
    %c0_i32_1 = arith.constant 0 : i32
    return %c0_i32, %c0_i32_0 : i32, i32
  }
  func.func @transform_5(%arg0: i32) -> (i32, i32) {
    %c0_i32 = arith.constant 0 : i32
    %c0_i32_0 = arith.constant 0 : i32
    %c0_i32_1 = arith.constant 0 : i32
    return %c0_i32, %c0_i32_0 : i32, i32
  }
  func.func @transform_6(%arg0: i32) -> (i32, i32) {
    %c0_i32 = arith.constant 0 : i32
    %c0_i32_0 = arith.constant 0 : i32
    %c0_i32_1 = arith.constant 0 : i32
    return %c0_i32, %c0_i32_0 : i32, i32
  }
  func.func @transform_7(%arg0: i32) -> (i32, i32) {
    %c0_i32 = arith.constant 0 : i32
    %c0_i32_0 = arith.constant 0 : i32
    %c0_i32_1 = arith.constant 0 : i32
    return %c0_i32, %c0_i32_0 : i32, i32
  }
  func.func @transform_8(%arg0: i32) -> (i32, i32) {
    %c0_i32 = arith.constant 0 : i32
    %c0_i32_0 = arith.constant 0 : i32
    %c0_i32_1 = arith.constant 0 : i32
    return %c0_i32, %c0_i32_0 : i32, i32
  }
  func.func @transform_9(%arg0: i32) -> (i32, i32) {
    %c0_i32 = arith.constant 0 : i32
    %c0_i32_0 = arith.constant 0 : i32
    %c0_i32_1 = arith.constant 0 : i32
    return %c0_i32, %c0_i32_0 : i32, i32
  }
  func.func @transform_10(%arg0: i32) -> (i32, i32) {
    %c0_i32 = arith.constant 0 : i32
    %c0_i32_0 = arith.constant 0 : i32
    %c0_i32_1 = arith.constant 0 : i32
    return %c0_i32, %c0_i32_0 : i32, i32
  }
  func.func @transform_11(%arg0: i32) -> (i32, i32) {
    %c0_i32 = arith.constant 0 : i32
    %c0_i32_0 = arith.constant 0 : i32
    return %arg0, %c0_i32 : i32, i32
  }
}

</mosaic_0001>

<bundles_post_ra>
// kernel: tpu_custom_call.1
= control target key start
LH: loop header
LB: loop body
LE: loop exit
PB: predicated region body
PF: predicated region fallthrough
CT: control target
= control target key end

     0   :  { %16 = vsyncpa [#allocation3], 0  ;;  %s1896_s0 = inlined_call_operand.hbm [shape: f32[16,20], index: 0, kind: input, shape index: {}]   ;;  %s1897_s1 = inlined_call_operand.hbm [shape: bf16[20,256], index: 1, kind: input, shape index: {}]   ;;  %s1898_s2 = inlined_call_operand.vmem [shape: f32[1,256], index: 2, kind: input, shape index: {}]   ;;  %s1899_s3 = inlined_call_operand.hbm [shape: bf16[256,256], index: 3, kind: input, shape index: {}]   ;;  %s1900_s4 = inlined_call_operand.vmem [shape: f32[1,256], index: 4, kind: input, shape index: {}]   ;;  %s1901_s5 = inlined_call_operand.hbm [shape: bf16[256,256], index: 5, kind: input, shape index: {}]   ;;  %s1902_s6 = inlined_call_operand.vmem [shape: f32[1,256], index: 6, kind: input, shape index: {}]   ;;  %s1903_s7 = inlined_call_operand.hbm [shape: bf16[256,256], index: 7, kind: input, shape index: {}]   ;;  %s1904_s8 = inlined_call_operand.vmem [shape: f32[1,256], index: 8, kind: input, shape index: {}]   ;;  %s1905_s9 = inlined_call_operand.hbm [shape: bf16[256,128], index: 9, kind: input, shape index: {}]   ;;  %s1906_s10 = inlined_call_operand.vmem [shape: f32[1,128], index: 10, kind: input, shape index: {}]   ;;  %s1907_s11 = inlined_call_operand.hbm [shape: bf16[16,128], index: 11, kind: output, shape index: {}]  }
   0x1   :  { %17 = vsyncpa [#allocation6], 0 }
   0x2   :  { %18 = vsyncpa [#allocation9], 0 }
   0x3   :  { %19 = vsyncpa [#allocation12], 0 }
   0x4   :  { %20 = vsyncpa [#allocation4], 0  ;;  %s1671_s17 = smov [#allocation5]   ;;  %s1672_s19 = smov [#allocation8]  }
   0x5   :  { %s38_s18 = sshll.u32 %s1671_s17, 4  ;;  %s66_s20 = sshll.u32 %s1672_s19, 4  ;;  %s39_s18 = int_to_ptr.vmem [resolvable:$true] %s38_s18  ;;  %s1743_s20 = int_to_ptr.vmem [resolvable:$true] %s66_s20 }
   0x6   :  { %s1507_s23 = scalar_lea.hbm %s1897_s1, 384 }
   0x7   :  { %p1508_p0 = scmp.ne.s32.totalorder %s1897_s1, %s1507_s23  ;;  %p1511_p1 = scmp.lt.u32.totalorder %s1507_s23, %s1897_s1 }
   0x9   :  { %p1513_p2 = pnand %p1511_p1, %p1508_p0 }
   0xb   :  { %1516 = shalt.err (!%p1513_p2)
}
   0xc   :  { %s1517_s28 = scalar_lea.vmem %s39_s18, 384  ;;  %p1522_p4 = scmp.lt.s32.totalorder %s39_s18, %s39_s18 }
   0xd   :  { %p1518_p3 = scmp.ne.s32.totalorder %s39_s18, %s1517_s28  ;;  %p1523_p5 = scmp.lt.s32.totalorder %s1517_s28, %s1517_s28 }
   0xf   :  { %p1524_p6 = por %p1523_p5, %p1522_p4 }
  0x11   :  { %p1525_p7 = pnand %p1524_p6, %p1518_p3 }
  0x13   :  { %1528 = shalt.err (!%p1525_p7)
}
  0x14   :  { %s1673_s29 = smov 128   ;;  %s1674_s30 = smov 8  }
  0x15   :  { %44 = dma.hbm_to_vmem [thread:$0]  %s1897_s1, 384, %s39_s18, [#allocation6], %s1673_s29, %s1673_s29, %s1674_s30  }
  0x16   :  { %s1529_s16 = scalar_lea.hbm %s1901_s5, 4096 }
  0x17   :  { %p1530_p8 = scmp.ne.s32.totalorder %s1901_s5, %s1529_s16  ;;  %p1533_p9 = scmp.lt.u32.totalorder %s1529_s16, %s1901_s5 }
  0x19   :  { %p1535_p10 = pnand %p1533_p9, %p1530_p8 }
  0x1b   :  { %1538 = shalt.err (!%p1535_p10)
}
  0x1c   :  { %s1539_s23 = scalar_lea.vmem %s1743_s20, 4096  ;;  %p1544_p12 = scmp.lt.s32.totalorder %s1743_s20, %s1743_s20 }
  0x1d   :  { %p1540_p11 = scmp.ne.s32.totalorder %s1743_s20, %s1539_s23  ;;  %p1545_p13 = scmp.lt.s32.totalorder %s1539_s23, %s1539_s23 }
  0x1f   :  { %p1546_p0 = por %p1545_p13, %p1544_p12 }
  0x21   :  { %p1547_p1 = pnand %p1546_p0, %p1540_p11 }
  0x23   :  { %1550 = shalt.err (!%p1547_p1)
}
  0x24   :  { %72 = dma.hbm_to_vmem [thread:$0]  %s1901_s5, 4096, %s1743_s20, [#allocation9], %s1673_s29, %s1673_s29, %s1674_s30  }
  0x25   :  { %s1675_s24 = smov [#allocation2]   ;;  %s1676_s26 = smov [#allocation7]  }
  0x26   :  { %s26_s25 = sshll.u32 %s1675_s24, 4  ;;  %s52_s27 = sshll.u32 %s1676_s26, 4  ;;  %s27_s25 = int_to_ptr.vmem [resolvable:$true] %s26_s25  ;;  %s1780_s27 = int_to_ptr.vmem [resolvable:$true] %s52_s27 }
  0x27   :  { %s1551_s13 = scalar_lea.hbm %s1896_s0, 256 }
  0x28   :  { %p1552_p2 = scmp.ne.s32.totalorder %s1896_s0, %s1551_s13  ;;  %p1555_p3 = scmp.lt.u32.totalorder %s1551_s13, %s1896_s0 }
  0x2a   :  { %p1557_p4 = pnand %p1555_p3, %p1552_p2 }
  0x2c   :  { %1560 = shalt.err (!%p1557_p4)
}
  0x2d   :  { %s1561_s5 = scalar_lea.vmem %s27_s25, 256  ;;  %p1566_p6 = scmp.lt.s32.totalorder %s27_s25, %s27_s25 }
  0x2e   :  { %p1562_p5 = scmp.ne.s32.totalorder %s27_s25, %s1561_s5  ;;  %p1567_p7 = scmp.lt.s32.totalorder %s1561_s5, %s1561_s5 }
  0x30   :  { %p1568_p8 = por %p1567_p7, %p1566_p6 }
  0x32   :  { %p1569_p9 = pnand %p1568_p8, %p1562_p5 }
  0x34   :  { %1572 = shalt.err (!%p1569_p9)
}
  0x35   :  { %32 = dma.hbm_to_vmem [thread:$0]  %s1896_s0, 256, %s27_s25, [#allocation3], %s1673_s29, %s1673_s29, %s1674_s30  }
  0x36   :  { %s1573_s23 = scalar_lea.hbm %s1899_s3, 4096 }
  0x37   :  { %p1574_p10 = scmp.ne.s32.totalorder %s1899_s3, %s1573_s23  ;;  %p1577_p11 = scmp.lt.u32.totalorder %s1573_s23, %s1899_s3 }
  0x39   :  { %p1579_p12 = pnand %p1577_p11, %p1574_p10 }
  0x3b   :  { %1582 = shalt.err (!%p1579_p12)
}
  0x3c   :  { %s1583_s28 = scalar_lea.vmem %s1780_s27, 4096  ;;  %p1588_p0 = scmp.lt.s32.totalorder %s1780_s27, %s1780_s27 }
  0x3d   :  { %p1584_p13 = scmp.ne.s32.totalorder %s1780_s27, %s1583_s28  ;;  %p1589_p1 = scmp.lt.s32.totalorder %s1583_s28, %s1583_s28 }
  0x3f   :  { %p1590_p2 = por %p1589_p1, %p1588_p0 }
  0x41   :  { %p1591_p3 = pnand %p1590_p2, %p1584_p13 }
  0x43   :  { %1594 = shalt.err (!%p1591_p3)
}
  0x44   :  { %58 = dma.hbm_to_vmem [thread:$0]  %s1899_s3, 4096, %s1780_s27, [#allocation6], %s1673_s29, %s1673_s29, %s1674_s30  }
  0x45   :  { %s1677_s12 = smov [#allocation10]   ;;  %s1678_s14 = smov [#allocation11]  }
  0x46   :  { %s80_s13 = sshll.u32 %s1677_s12, 4  ;;  %s94_s15 = sshll.u32 %s1678_s14, 4  ;;  %s81_s13 = int_to_ptr.vmem [resolvable:$true] %s80_s13  ;;  %s1817_s15 = int_to_ptr.vmem [resolvable:$true] %s94_s15 }
  0x47   :  { %s1595_s5 = scalar_lea.hbm %s1903_s7, 4096 }
  0x48   :  { %p1596_p4 = scmp.ne.s32.totalorder %s1903_s7, %s1595_s5  ;;  %p1599_p5 = scmp.lt.u32.totalorder %s1595_s5, %s1903_s7 }
  0x4a   :  { %p1601_p6 = pnand %p1599_p5, %p1596_p4 }
  0x4c   :  { %1604 = shalt.err (!%p1601_p6)
}
  0x4d   :  { %s1605_s3 = scalar_lea.vmem %s81_s13, 4096  ;;  %p1610_p8 = scmp.lt.s32.totalorder %s81_s13, %s81_s13 }
  0x4e   :  { %p1606_p7 = scmp.ne.s32.totalorder %s81_s13, %s1605_s3  ;;  %p1611_p9 = scmp.lt.s32.totalorder %s1605_s3, %s1605_s3 }
  0x50   :  { %p1612_p10 = por %p1611_p9, %p1610_p8 }
  0x52   :  { %p1613_p11 = pnand %p1612_p10, %p1606_p7 }
  0x54   :  { %1616 = shalt.err (!%p1613_p11)
}
  0x55   :  { %86 = dma.hbm_to_vmem [thread:$0]  %s1903_s7, 4096, %s81_s13, [#allocation9], %s1673_s29, %s1673_s29, %s1674_s30  }
  0x56   :  { %s1617_s24 = scalar_lea.hbm %s1905_s9, 2048 }
  0x57   :  { %p1618_p12 = scmp.ne.s32.totalorder %s1905_s9, %s1617_s24  ;;  %p1621_p13 = scmp.lt.u32.totalorder %s1617_s24, %s1905_s9 }
  0x59   :  { %p1623_p0 = pnand %p1621_p13, %p1618_p12 }
  0x5b   :  { %1626 = shalt.err (!%p1623_p0)
}
  0x5c   :  { %s1627_s12 = scalar_lea.vmem %s1817_s15, 2048  ;;  %p1632_p2 = scmp.lt.s32.totalorder %s1817_s15, %s1817_s15 }
  0x5d   :  { %p1628_p1 = scmp.ne.s32.totalorder %s1817_s15, %s1627_s12  ;;  %p1633_p3 = scmp.lt.s32.totalorder %s1627_s12, %s1627_s12 }
  0x5f   :  { %p1634_p4 = por %p1633_p3, %p1632_p2 }
  0x61   :  { %p1635_p5 = pnand %p1634_p4, %p1628_p1 }
  0x63   :  { %1638 = shalt.err (!%p1635_p5)
}
  0x64   :  { %s1679_s7 = smov 64   ;;  %s1680_s29 = smov 4  }
  0x65   :  { %100 = dma.hbm_to_vmem [thread:$0]  %s1905_s9, 2048, %s1817_s15, [#allocation12], %s1679_s7, %s1679_s7, %s1680_s29  }
  0x66   :  { %1661 = dma.done.wait [#allocation3], 256  }
  0x67   :  { %1662 = vsyncadd [#allocation3], 4294967040 }
  0x68   :  { %1663 = dma.done.wait [#allocation6], 4480  }
  0x69   :  { %1664 = vsyncadd [#allocation6], 4294962816 }
  0x6a   :  { %1665 = dma.done.wait [#allocation9], 8192  }
  0x6b   :  { %1666 = vsyncadd [#allocation9], 4294959104 }
  0x6c   :  { %1667 = dma.done.wait [#allocation12], 2048  }
  0x6d   :  { %1668 = vsyncadd [#allocation12], 4294965248  ;;  %v1681_v0 = vmov 0   ;;  %v1342_v1 = vld [vmem:[#allocation5 + $0x4] ss:$8 sps:$4 sm:$0xff]   ;;  %vm159_vm0 = vcmask 1041408  }
  0x6e   :  { %198 = vmatprep.mubr.bf16.mxu0 %v1681_v0  ;;  %v1344_v2 = vld [vmem:[#allocation5] ss:$8 sps:$4 sm:$0xff]   ;;  %v127_v3 = vld [vmem:[#allocation5 + $0x10] sm:$0x33]  ;;  %166 = vmatprep.subr.bf16.mxu0 %v1342_v1  ;;  %v123_v7 = vld [vmem:[#allocation2 + $0x8] sm:$0xff]  ;;  %vm155_vm1 = vcmask 162816  }
  0x6f   :  { %v122_v4 = vld [vmem:[#allocation2] sm:$0xff]  ;;  %v1183_v5 = vcombine.high %v127_v3, %v127_v3  ;;  %v1182_v6 = vcombine.low %v127_v3, %v127_v3  ;;  %167 = vmatpush1.bf16.msra.mxu0 %v1344_v2  ;;  %v1347_v8 = vld [vmem:[#allocation7 + $0x4] ss:$8 sps:$4 sm:$0xff]   ;;  %v1349_v9 = vld [vmem:[#allocation7] ss:$8 sps:$4 sm:$0xff]   ;;  %s1682_s20 = smov [#allocation13]  }
  0x70   :  { %v1350_v11 = vld [vmem:[#allocation7 + $0x14] ss:$8 sps:$4 sm:$0xff]   ;;  %419 = vmatprep.subr.bf16.mxu1 %v1347_v8  ;;  %v124_v12 = vpack.c.bf16 %v123_v7, %v122_v4  ;;  %v1352_v13 = vld [vmem:[#allocation7 + $0x10] ss:$8 sps:$4 sm:$0xff]   ;;  %v1353_v14 = vld [vmem:[#allocation7 + $0x24] ss:$8 sps:$4 sm:$0xff]  }
  0x71   :  { %1184 = vmatprep.subr.msk.bf16.mxu0 %vm159_vm0, %v1183_v5  ;;  %v161_v10 = vsel %vm159_vm0, %v1182_v6, 0  ;;  %420 = vmatpush1.bf16.msra.mxu1 %v1349_v9  ;;  %v1355_v15 = vld [vmem:[#allocation7 + $0x20] ss:$8 sps:$4 sm:$0xff]   ;;  %v1356_v16 = vld [vmem:[#allocation7 + $0x34] ss:$8 sps:$4 sm:$0xff]   ;;  %v130_v6 = vlaneseq  ;;  %s1165_s19 = sshll.u32 %s1682_s20, 4  ;;  %s1166_s19 = int_to_ptr.vmem [resolvable:$true] %s1165_s19 }
  0x72   :  { %421 = vmatprep.subr.bf16.mxu1 %v1350_v11  ;;  %v1358_v17 = vld [vmem:[#allocation7 + $0x30] ss:$8 sps:$4 sm:$0xff]   ;;  %v1359_v18 = vld [vmem:[#allocation7 + $0x44] ss:$8 sps:$4 sm:$0xff]   ;;  %v1361_v19 = vld [vmem:[#allocation7 + $0x40] ss:$8 sps:$4 sm:$0xff]   ;;  %p1644_p7 = scmp.lt.s32.totalorder %s1166_s19, %s1166_s19 }
  0x73   :  { %169 = vmatpush1.bf16.msra.mxu0 %v161_v10  ;;  %v1362_v20 = vld [vmem:[#allocation7 + $0x54] ss:$8 sps:$4 sm:$0xff]   ;;  %v1364_v21 = vld [vmem:[#allocation7 + $0x50] ss:$8 sps:$4 sm:$0xff]   ;;  %v1365_v22 = vld [vmem:[#allocation7 + $0x64] ss:$8 sps:$4 sm:$0xff]  }
  0x74   :  { %v1367_v23 = vld [vmem:[#allocation7 + $0x60] ss:$8 sps:$4 sm:$0xff]   ;;  %v1368_v24 = vld [vmem:[#allocation7 + $0x74] ss:$8 sps:$4 sm:$0xff]   ;;  %v1370_v25 = vld [vmem:[#allocation7 + $0x70] ss:$8 sps:$4 sm:$0xff]  }
  0x75   :  { %422 = vmatpush1.bf16.msra.mxu1 %v1352_v13  ;;  %v1371_v26 = vld [vmem:[#allocation7 + $0x84] ss:$8 sps:$4 sm:$0xff]   ;;  %v1373_v27 = vld [vmem:[#allocation7 + $0x80] ss:$8 sps:$4 sm:$0xff]   ;;  %v1374_v28 = vld [vmem:[#allocation7 + $0x94] ss:$8 sps:$4 sm:$0xff]  }
  0x76   :  { %1185 = vmatmul.mubr.msk.bf16.vlgmr.msra.gmra.mrb[0].mxu0 %vm155_vm1, %v124_v12  ;;  %423 = vmatprep.subr.bf16.mxu1 %v1353_v14  ;;  %v1376_v29 = vld [vmem:[#allocation7 + $0x90] ss:$8 sps:$4 sm:$0xff]   ;;  %v1377_v30 = vld [vmem:[#allocation7 + $0xa4] ss:$8 sps:$4 sm:$0xff]   ;;  %v1379_v31 = vld [vmem:[#allocation7 + $0xa0] ss:$8 sps:$4 sm:$0xff]  }
  0x77   :  { %v1380_v32 = vld [vmem:[#allocation7 + $0xb4] ss:$8 sps:$4 sm:$0xff]   ;;  %v1382_v33 = vld [vmem:[#allocation7 + $0xb0] ss:$8 sps:$4 sm:$0xff]   ;;  %v1383_v34 = vld [vmem:[#allocation7 + $0xc4] ss:$8 sps:$4 sm:$0xff]  }
  0x78   :  { %v1385_v35 = vld [vmem:[#allocation7 + $0xc0] ss:$8 sps:$4 sm:$0xff]   ;;  %v1386_v36 = vld [vmem:[#allocation7 + $0xd4] ss:$8 sps:$4 sm:$0xff]   ;;  %v1388_v37 = vld [vmem:[#allocation7 + $0xd0] ss:$8 sps:$4 sm:$0xff]  }
  0x79   :  { %424 = vmatpush1.bf16.msra.mxu1 %v1355_v15  ;;  %v1389_v38 = vld [vmem:[#allocation7 + $0xe4] ss:$8 sps:$4 sm:$0xff]   ;;  %v1391_v39 = vld [vmem:[#allocation7 + $0xe0] ss:$8 sps:$4 sm:$0xff]   ;;  %v1392_v40 = vld [vmem:[#allocation7 + $0xf4] ss:$8 sps:$4 sm:$0xff]  }
  0x7a   :  { %425 = vmatprep.subr.bf16.mxu1 %v1356_v16  ;;  %v1394_v41 = vld [vmem:[#allocation7 + $0xf0] ss:$8 sps:$4 sm:$0xff]   ;;  %v1395_v42 = vld [vmem:[#allocation8] ss:$8 sps:$4 sm:$0xff]   ;;  %v1397_v43 = vld [vmem:[#allocation8 + $0x4] ss:$8 sps:$4 sm:$0xff]  }
  0x7b   :  { %v1400_v44 = vld [vmem:[#allocation8 + $0x14] ss:$8 sps:$4 sm:$0xff]   ;;  %672 = vmatprep.subr.bf16.mxu0 %v1397_v43  ;;  %v1398_v45 = vld [vmem:[#allocation8 + $0x10] ss:$8 sps:$4 sm:$0xff]   ;;  %v1403_v46 = vld [vmem:[#allocation8 + $0x24] ss:$8 sps:$4 sm:$0xff]  }
  0x7c   :  { %673 = vmatpush1.bf16.msra.mxu0 %v1395_v42  ;;  %v1401_v47 = vld [vmem:[#allocation8 + $0x20] ss:$8 sps:$4 sm:$0xff]   ;;  %v1406_v48 = vld [vmem:[#allocation8 + $0x34] ss:$8 sps:$4 sm:$0xff]   ;;  %v1404_v49 = vld [vmem:[#allocation8 + $0x30] ss:$8 sps:$4 sm:$0xff]  }
  0x7d   :  { %426 = vmatpush1.bf16.msra.mxu1 %v1358_v17  ;;  %674 = vmatprep.subr.bf16.mxu0 %v1400_v44  ;;  %v1409_v50 = vld [vmem:[#allocation8 + $0x44] ss:$8 sps:$4 sm:$0xff]   ;;  %v1407_v51 = vld [vmem:[#allocation8 + $0x40] ss:$8 sps:$4 sm:$0xff]   ;;  %v1412_v52 = vld [vmem:[#allocation8 + $0x54] ss:$8 sps:$4 sm:$0xff]  }
  0x7e   :  { %427 = vmatprep.subr.bf16.mxu1 %v1359_v18  ;;  %v1410_v53 = vld [vmem:[#allocation8 + $0x50] ss:$8 sps:$4 sm:$0xff]   ;;  %v1415_v54 = vld [vmem:[#allocation8 + $0x64] ss:$8 sps:$4 sm:$0xff]   ;;  %v1413_v55 = vld [vmem:[#allocation8 + $0x60] ss:$8 sps:$4 sm:$0xff]  }
  0x7f   :  { %v1418_v56 = vld [vmem:[#allocation8 + $0x74] ss:$8 sps:$4 sm:$0xff]   ;;  %v1416_v57 = vld [vmem:[#allocation8 + $0x70] ss:$8 sps:$4 sm:$0xff]   ;;  %v1421_v58 = vld [vmem:[#allocation8 + $0x84] ss:$8 sps:$4 sm:$0xff]  }
  0x80   :  { %675 = vmatpush1.bf16.msra.mxu0 %v1398_v45  ;;  %v1419_v59 = vld [vmem:[#allocation8 + $0x80] ss:$8 sps:$4 sm:$0xff]   ;;  %v1424_v60 = vld [vmem:[#allocation8 + $0x94] ss:$8 sps:$4 sm:$0xff]   ;;  %v1422_v61 = vld [vmem:[#allocation8 + $0x90] ss:$8 sps:$4 sm:$0xff]  }
  0x81   :  { %428 = vmatpush1.bf16.msra.mxu1 %v1361_v19  ;;  %676 = vmatprep.subr.bf16.mxu0 %v1403_v46  ;;  %v1427_v62 = vld [vmem:[#allocation8 + $0xa4] ss:$8 sps:$4 sm:$0xff]   ;;  %v1425_v63 = vld [vmem:[#allocation8 + $0xa0] ss:$8 sps:$4 sm:$0xff]   ;;  %v1430_v0 = vld [vmem:[#allocation8 + $0xb4] ss:$8 sps:$4 sm:$0xff]  }
  0x82   :  { %429 = vmatprep.subr.bf16.mxu1 %v1362_v20  ;;  %v1428_v1 = vld [vmem:[#allocation8 + $0xb0] ss:$8 sps:$4 sm:$0xff]   ;;  %v1433_v2 = vld [vmem:[#allocation8 + $0xc4] ss:$8 sps:$4 sm:$0xff]   ;;  %v1431_v3 = vld [vmem:[#allocation8 + $0xc0] ss:$8 sps:$4 sm:$0xff]  }
  0x83   :  { %v1436_v4 = vld [vmem:[#allocation8 + $0xd4] ss:$8 sps:$4 sm:$0xff]   ;;  %v1434_v5 = vld [vmem:[#allocation8 + $0xd0] ss:$8 sps:$4 sm:$0xff]   ;;  %v131_v7 = vshrl.u32 %v130_v6, 7  ;;  %s1639_s21 = scalar_lea.vmem %s1166_s19, 128 }
  0x84   :  { %677 = vmatpush1.bf16.msra.mxu0 %v1401_v47  ;;  %v128_v9 = vld [vmem:[%s1898_s2] sm:$0x3]  ;;  %v1463_v43 = vld [vmem:[#allocation10 + $0x64] ss:$8 sps:$4 sm:$0xff]   ;;  %v1461_v44 = vld [vmem:[#allocation10 + $0x60] ss:$8 sps:$4 sm:$0xff]   ;;  %p1640_p6 = scmp.ne.s32.totalorder %s1166_s19, %s1639_s21  ;;  %p1645_p8 = scmp.lt.s32.totalorder %s1639_s21, %s1639_s21 }
  0x85   :  { %430 = vmatpush1.bf16.msra.mxu1 %v1364_v21  ;;  %678 = vmatprep.subr.bf16.mxu0 %v1406_v48  ;;  %v1854_v8 = vsub.s32 0, %v131_v7  ;;  %v1859_v10 = vsub.s32 1, %v131_v7  ;;  %v1458_v42 = vld [vmem:[#allocation10 + $0x50] ss:$8 sps:$4 sm:$0xff]   ;;  %v1466_v45 = vld [vmem:[#allocation10 + $0x74] ss:$8 sps:$4 sm:$0xff]  }
  0x86   :  { %431 = vmatprep.subr.bf16.mxu1 %v1365_v22  ;;  %v1464_v46 = vld [vmem:[#allocation10 + $0x70] ss:$8 sps:$4 sm:$0xff]   ;;  %v1469_v47 = vld [vmem:[#allocation10 + $0x84] ss:$8 sps:$4 sm:$0xff]   ;;  %v1467_v48 = vld [vmem:[#allocation10 + $0x80] ss:$8 sps:$4 sm:$0xff]   ;;  %p1646_p9 = por %p1645_p8, %p1644_p7 }
  0x87   :  { %v133_v11 = vrot.slane %v128_v9, %v1854_v8  ;;  %v137_v12 = vrot.slane %v128_v9, %v1859_v10 }
  0x88   :  { %679 = vmatpush1.bf16.msra.mxu0 %v1404_v49  ;;  %v1472_v49 = vld [vmem:[#allocation10 + $0x94] ss:$8 sps:$4 sm:$0xff]   ;;  %p1647_p10 = pnand %p1646_p9, %p1640_p6 }
  0x89   :  { %432 = vmatpush1.bf16.msra.mxu1 %v1367_v23  ;;  %680 = vmatprep.subr.bf16.mxu0 %v1409_v50  ;;  %v1470_v50 = vld [vmem:[#allocation10 + $0x90] ss:$8 sps:$4 sm:$0xff]  }
  0x8a   :  { %433 = vmatprep.subr.bf16.mxu1 %v1368_v24 }
  0x8c   :  { %681 = vmatpush1.bf16.msra.mxu0 %v1407_v51  ;;  %v1475_v51 = vld [vmem:[#allocation10 + $0xa4] ss:$8 sps:$4 sm:$0xff]  }
  0x8d   :  { %434 = vmatpush1.bf16.msra.mxu1 %v1370_v25  ;;  %682 = vmatprep.subr.bf16.mxu0 %v1412_v52  ;;  %v1473_v52 = vld [vmem:[#allocation10 + $0xa0] ss:$8 sps:$4 sm:$0xff]  }
  0x8e   :  { %435 = vmatprep.subr.bf16.mxu1 %v1371_v26 }
  0x90   :  { %683 = vmatpush1.bf16.msra.mxu0 %v1410_v53  ;;  %v1478_v53 = vld [vmem:[#allocation10 + $0xb4] ss:$8 sps:$4 sm:$0xff]  }
  0x91   :  { %436 = vmatpush1.bf16.msra.mxu1 %v1373_v27  ;;  %684 = vmatprep.subr.bf16.mxu0 %v1415_v54  ;;  %v1439_v27 = vld [vmem:[#allocation8 + $0xe4] ss:$8 sps:$4 sm:$0xff]   ;;  %v1476_v54 = vld [vmem:[#allocation10 + $0xb0] ss:$8 sps:$4 sm:$0xff]  }
  0x92   :  { %437 = vmatprep.subr.bf16.mxu1 %v1374_v28  ;;  %v1437_v28 = vld [vmem:[#allocation8 + $0xe0] ss:$8 sps:$4 sm:$0xff]  }
  0x94   :  { %685 = vmatpush1.bf16.msra.mxu0 %v1413_v55  ;;  %v1481_v55 = vld [vmem:[#allocation10 + $0xc4] ss:$8 sps:$4 sm:$0xff]  }
  0x95   :  { %438 = vmatpush1.bf16.msra.mxu1 %v1376_v29  ;;  %686 = vmatprep.subr.bf16.mxu0 %v1418_v56  ;;  %v1442_v29 = vld [vmem:[#allocation8 + $0xf4] ss:$8 sps:$4 sm:$0xff]   ;;  %v1479_v56 = vld [vmem:[#allocation10 + $0xc0] ss:$8 sps:$4 sm:$0xff]  }
  0x96   :  { %439 = vmatprep.subr.bf16.mxu1 %v1377_v30  ;;  %v1440_v30 = vld [vmem:[#allocation8 + $0xf0] ss:$8 sps:$4 sm:$0xff]  }
  0x98   :  { %687 = vmatpush1.bf16.msra.mxu0 %v1416_v57  ;;  %v1484_v57 = vld [vmem:[#allocation10 + $0xd4] ss:$8 sps:$4 sm:$0xff]  }
  0x99   :  { %440 = vmatpush1.bf16.msra.mxu1 %v1379_v31  ;;  %688 = vmatprep.subr.bf16.mxu0 %v1421_v58  ;;  %v1443_v31 = vld [vmem:[#allocation10] ss:$8 sps:$4 sm:$0xff]   ;;  %v1482_v58 = vld [vmem:[#allocation10 + $0xd0] ss:$8 sps:$4 sm:$0xff]  }
  0x9a   :  { %441 = vmatprep.subr.bf16.mxu1 %v1380_v32  ;;  %v1445_v32 = vld [vmem:[#allocation10 + $0x4] ss:$8 sps:$4 sm:$0xff]  }
  0x9c   :  { %689 = vmatpush1.bf16.msra.mxu0 %v1419_v59  ;;  %v247_v59 = vld [vmem:[%s1900_s4] sm:$0x3] }
  0x9d   :  { %442 = vmatpush1.bf16.msra.mxu1 %v1382_v33  ;;  %690 = vmatprep.subr.bf16.mxu0 %v1424_v60  ;;  %v1448_v33 = vld [vmem:[#allocation10 + $0x14] ss:$8 sps:$4 sm:$0xff]   ;;  %v252_v60 = vrot.slane %v247_v59, %v1854_v8 }
  0x9e   :  { %443 = vmatprep.subr.bf16.mxu1 %v1383_v34  ;;  %v1446_v34 = vld [vmem:[#allocation10 + $0x10] ss:$8 sps:$4 sm:$0xff]  }
  0xa0   :  { %691 = vmatpush1.bf16.msra.mxu0 %v1422_v61  ;;  %v256_v61 = vrot.slane %v247_v59, %v1859_v10 }
  0xa1   :  { %444 = vmatpush1.bf16.msra.mxu1 %v1385_v35  ;;  %692 = vmatprep.subr.bf16.mxu0 %v1427_v62  ;;  %v1451_v35 = vld [vmem:[#allocation10 + $0x24] ss:$8 sps:$4 sm:$0xff]  }
  0xa2   :  { %445 = vmatprep.subr.bf16.mxu1 %v1386_v36  ;;  %v1449_v36 = vld [vmem:[#allocation10 + $0x20] ss:$8 sps:$4 sm:$0xff]  }
  0xa4   :  { %693 = vmatpush1.bf16.msra.mxu0 %v1425_v63 }
  0xa5   :  { %446 = vmatpush1.bf16.msra.mxu1 %v1388_v37  ;;  %694 = vmatprep.subr.bf16.mxu0 %v1430_v0  ;;  %v1454_v37 = vld [vmem:[#allocation10 + $0x34] ss:$8 sps:$4 sm:$0xff]  }
  0xa6   :  { %447 = vmatprep.subr.bf16.mxu1 %v1389_v38  ;;  %v1452_v38 = vld [vmem:[#allocation10 + $0x30] ss:$8 sps:$4 sm:$0xff]  }
  0xa8   :  { %695 = vmatpush1.bf16.msra.mxu0 %v1428_v1 }
  0xa9   :  { %448 = vmatpush1.bf16.msra.mxu1 %v1391_v39  ;;  %696 = vmatprep.subr.bf16.mxu0 %v1433_v2  ;;  %v1457_v39 = vld [vmem:[#allocation10 + $0x44] ss:$8 sps:$4 sm:$0xff]  }
  0xaa   :  { %449 = vmatprep.subr.bf16.mxu1 %v1392_v40  ;;  %v1455_v40 = vld [vmem:[#allocation10 + $0x40] ss:$8 sps:$4 sm:$0xff]  }
  0xac   :  { %697 = vmatpush1.bf16.msra.mxu0 %v1431_v3 }
  0xad   :  { %450 = vmatpush1.bf16.msra.mxu1 %v1394_v41  ;;  %698 = vmatprep.subr.bf16.mxu0 %v1436_v4  ;;  %v1460_v41 = vld [vmem:[#allocation10 + $0x54] ss:$8 sps:$4 sm:$0xff]  }
  0xae   :  { %925 = vmatprep.subr.bf16.mxu1 %v1445_v32 }
  0xb0   :  { %699 = vmatpush1.bf16.msra.mxu0 %v1434_v5 }
  0xb1   :  { %700 = vmatprep.subr.bf16.mxu0 %v1439_v27  ;;  %v1500_v27 = vld [vmem:[#allocation11 + $0x20] sm:$0xff]  }
  0xb4   :  { %701 = vmatpush1.bf16.msra.mxu0 %v1437_v28  ;;  %v1501_v28 = vld [vmem:[#allocation11 + $0x68] sm:$0xff]  }
  0xb5   :  { %702 = vmatprep.subr.bf16.mxu0 %v1442_v29  ;;  %v500_v29 = vld [vmem:[%s1902_s6] sm:$0x3] }
  0xb8   :  { %703 = vmatpush1.bf16.msra.mxu0 %v1440_v30  ;;  %v505_v30 = vrot.slane %v500_v29, %v1854_v8 }
 0x149   :  { %v200_v13 = vpop.f32.mrb[0].mxu0 }
 0x14a   :  { %v201_v14 = vadd.f32 %v200_v13, %v133_v11  ;;  %v202_v15 = vpop.f32.mrb[1].mxu0 }
 0x14b   :  { %v203_v16 = vadd.f32 %v202_v15, %v137_v12  ;;  %v204_v17 = vpop.f32.mrb[2].mxu0  ;;  %v1485_v15 = vld [vmem:[#allocation10 + $0xe0] ss:$8 sps:$4 sm:$0xff]  }
 0x14c   :  { %v205_v18 = vadd.f32 %v204_v17, %v133_v11  ;;  %v206_v19 = vpop.f32.mrb[3].mxu0  ;;  %v209_v21 = vmax.f32 %v201_v14, 0.0  ;;  %v1487_v14 = vld [vmem:[#allocation10 + $0xe4] ss:$8 sps:$4 sm:$0xff]   ;;  %v1488_v17 = vld [vmem:[#allocation10 + $0xf0] ss:$8 sps:$4 sm:$0xff]  }
 0x14d   :  { %v207_v20 = vadd.f32 %v206_v19, %v137_v12  ;;  %v210_v23 = vmax.f32 %v203_v16, 0.0  ;;  %v1490_v16 = vld [vmem:[#allocation10 + $0xf4] ss:$8 sps:$4 sm:$0xff]   ;;  %v1492_v19 = vld [vmem:[#allocation11] sm:$0xff]  }
 0x14e   :  { %v211_v22 = vmax.f32 %v205_v18, 0.0  ;;  %v1491_v18 = vld [vmem:[#allocation11 + $0x40] sm:$0xff]  }
 0x14f   :  { %v212_v24 = vmax.f32 %v207_v20, 0.0  ;;  %v1493_v20 = vld [vmem:[#allocation11 + $0x48] sm:$0xff]   ;;  %1308 = vmatprep.subr.bf16.mxu0 %v1491_v18 }
 0x150   :  { %v213_v25 = vpack.c.bf16 %v211_v22, %v209_v21  ;;  %v1494_v21 = vld [vmem:[#allocation11 + $0x8] sm:$0xff]   ;;  %v1495_v22 = vld [vmem:[#allocation11 + $0x50] sm:$0xff]  }
 0x151   :  { %v214_v26 = vpack.c.bf16 %v212_v24, %v210_v23  ;;  %v1496_v23 = vld [vmem:[#allocation11 + $0x10] sm:$0xff]   ;;  %v1497_v24 = vld [vmem:[#allocation11 + $0x58] sm:$0xff]  }
 0x153   :  { %451 = vmatprep.mubr.bf16.mxu1 %v214_v26  ;;  %v1499_v26 = vld [vmem:[#allocation11 + $0x60] sm:$0xff]  }
 0x154   :  { %452 = vmatmul.mubr.bf16.vlgmr.msra.gmra.mrb[0].mxu1 %v213_v25  ;;  %v1498_v25 = vld [vmem:[#allocation11 + $0x18] sm:$0xff]  }
 0x155   :  { %926 = vmatpush1.bf16.msra.mxu1 %v1443_v31  ;;  %v509_v31 = vrot.slane %v500_v29, %v1859_v10 }
 0x156   :  { %927 = vmatprep.subr.bf16.mxu1 %v1448_v33 }
 0x159   :  { %928 = vmatpush1.bf16.msra.mxu1 %v1446_v34 }
 0x15a   :  { %929 = vmatprep.subr.bf16.mxu1 %v1451_v35 }
 0x15d   :  { %930 = vmatpush1.bf16.msra.mxu1 %v1449_v36 }
 0x15e   :  { %931 = vmatprep.subr.bf16.mxu1 %v1454_v37 }
 0x161   :  { %932 = vmatpush1.bf16.msra.mxu1 %v1452_v38 }
 0x162   :  { %933 = vmatprep.subr.bf16.mxu1 %v1457_v39 }
 0x165   :  { %934 = vmatpush1.bf16.msra.mxu1 %v1455_v40 }
 0x166   :  { %935 = vmatprep.subr.bf16.mxu1 %v1460_v41 }
 0x169   :  { %936 = vmatpush1.bf16.msra.mxu1 %v1458_v42 }
 0x16a   :  { %937 = vmatprep.subr.bf16.mxu1 %v1463_v43 }
 0x16d   :  { %938 = vmatpush1.bf16.msra.mxu1 %v1461_v44 }
 0x16e   :  { %939 = vmatprep.subr.bf16.mxu1 %v1466_v45 }
 0x171   :  { %940 = vmatpush1.bf16.msra.mxu1 %v1464_v46  ;;  %v1502_v46 = vld [vmem:[#allocation11 + $0x28] sm:$0xff]  }
 0x172   :  { %941 = vmatprep.subr.bf16.mxu1 %v1469_v47  ;;  %v1503_v47 = vld [vmem:[#allocation11 + $0x70] sm:$0xff]  }
 0x175   :  { %942 = vmatpush1.bf16.msra.mxu1 %v1467_v48  ;;  %v1504_v48 = vld [vmem:[#allocation11 + $0x30] sm:$0xff]  }
 0x176   :  { %943 = vmatprep.subr.bf16.mxu1 %v1472_v49  ;;  %v1505_v49 = vld [vmem:[#allocation11 + $0x78] sm:$0xff]  }
 0x179   :  { %944 = vmatpush1.bf16.msra.mxu1 %v1470_v50  ;;  %v1506_v50 = vld [vmem:[#allocation11 + $0x38] sm:$0xff]  }
 0x17a   :  { %945 = vmatprep.subr.bf16.mxu1 %v1475_v51  ;;  %v753_v51 = vld [vmem:[%s1904_s8] sm:$0x3] }
 0x17d   :  { %946 = vmatpush1.bf16.msra.mxu1 %v1473_v52  ;;  %v758_v52 = vrot.slane %v753_v51, %v1854_v8 }
 0x17e   :  { %947 = vmatprep.subr.bf16.mxu1 %v1478_v53  ;;  %v762_v53 = vrot.slane %v753_v51, %v1859_v10 }
 0x181   :  { %948 = vmatpush1.bf16.msra.mxu1 %v1476_v54 }
 0x182   :  { %949 = vmatprep.subr.bf16.mxu1 %v1481_v55 }
 0x185   :  { %950 = vmatpush1.bf16.msra.mxu1 %v1479_v56 }
 0x186   :  { %951 = vmatprep.subr.bf16.mxu1 %v1484_v57 }
 0x189   :  { %952 = vmatpush1.bf16.msra.mxu1 %v1482_v58 }
 0x18a   :  { %953 = vmatprep.subr.bf16.mxu1 %v1487_v14 }
 0x18d   :  { %954 = vmatpush1.bf16.msra.mxu1 %v1485_v15 }
 0x18e   :  { %955 = vmatprep.subr.bf16.mxu1 %v1490_v16 }
 0x191   :  { %956 = vmatpush1.bf16.msra.mxu1 %v1488_v17 }
 0x227   :  { %v453_v62 = vpop.f32.mrb[0].mxu1 }
 0x228   :  { %v454_v63 = vadd.f32 %v453_v62, %v252_v60  ;;  %v455_v0 = vpop.f32.mrb[1].mxu1 }
 0x229   :  { %v456_v1 = vadd.f32 %v455_v0, %v256_v61  ;;  %v457_v2 = vpop.f32.mrb[2].mxu1 }
 0x22a   :  { %v458_v3 = vadd.f32 %v457_v2, %v252_v60  ;;  %v459_v4 = vpop.f32.mrb[3].mxu1  ;;  %v462_v6 = vmax.f32 %v454_v63, 0.0 }
 0x22b   :  { %v460_v5 = vadd.f32 %v459_v4, %v256_v61  ;;  %v463_v9 = vmax.f32 %v456_v1, 0.0 }
 0x22c   :  { %v464_v7 = vmax.f32 %v458_v3, 0.0 }
 0x22d   :  { %v465_v11 = vmax.f32 %v460_v5, 0.0 }
 0x22e   :  { %v466_v12 = vpack.c.bf16 %v464_v7, %v462_v6  ;;  %v1282_v6 = vld [vmem:[%s1906_s10] ss:$0 sm:$0xff] }
 0x22f   :  { %v467_v13 = vpack.c.bf16 %v465_v11, %v463_v9 }
 0x231   :  { %704 = vmatprep.mubr.bf16.mxu0 %v467_v13 }
 0x232   :  { %705 = vmatmul.mubr.bf16.vlgmr.msra.gmra.mrb[4].mxu0 %v466_v12 }
 0x233   :  { %1309 = vmatpush3.bf16.msra.mxu0 %v1492_v19 }
 0x234   :  { %1310 = vmatprep.subr.bf16.mxu0 %v1493_v20 }
 0x237   :  { %1311 = vmatpush3.bf16.msra.mxu0 %v1494_v21 }
 0x238   :  { %1312 = vmatprep.subr.bf16.mxu0 %v1495_v22 }
 0x23b   :  { %1313 = vmatpush3.bf16.msra.mxu0 %v1496_v23 }
 0x23c   :  { %1314 = vmatprep.subr.bf16.mxu0 %v1497_v24 }
 0x23f   :  { %1315 = vmatpush3.bf16.msra.mxu0 %v1498_v25 }
 0x240   :  { %1316 = vmatprep.subr.bf16.mxu0 %v1499_v26 }
 0x243   :  { %1317 = vmatpush3.bf16.msra.mxu0 %v1500_v27 }
 0x244   :  { %1318 = vmatprep.subr.bf16.mxu0 %v1501_v28 }
 0x247   :  { %1319 = vmatpush3.bf16.msra.mxu0 %v1502_v46 }
 0x248   :  { %1320 = vmatprep.subr.bf16.mxu0 %v1503_v47 }
 0x24b   :  { %1321 = vmatpush3.bf16.msra.mxu0 %v1504_v48 }
 0x24c   :  { %1322 = vmatprep.subr.bf16.mxu0 %v1505_v49 }
 0x24f   :  { %1323 = vmatpush3.bf16.msra.mxu0 %v1506_v50 }
 0x305   :  { %v706_v32 = vpop.f32.mrb[4].mxu0 }
 0x306   :  { %v707_v33 = vadd.f32 %v706_v32, %v505_v30  ;;  %v708_v34 = vpop.f32.mrb[5].mxu0 }
 0x307   :  { %v709_v35 = vadd.f32 %v708_v34, %v509_v31  ;;  %v710_v36 = vpop.f32.mrb[6].mxu0 }
 0x308   :  { %v711_v37 = vadd.f32 %v710_v36, %v505_v30  ;;  %v712_v38 = vpop.f32.mrb[7].mxu0  ;;  %v715_v40 = vmax.f32 %v707_v33, 0.0 }
 0x309   :  { %v713_v39 = vadd.f32 %v712_v38, %v509_v31  ;;  %v716_v42 = vmax.f32 %v709_v35, 0.0 }
 0x30a   :  { %v717_v41 = vmax.f32 %v711_v37, 0.0 }
 0x30b   :  { %v718_v43 = vmax.f32 %v713_v39, 0.0 }
 0x30c   :  { %v719_v44 = vpack.c.bf16 %v717_v41, %v715_v40 }
 0x30d   :  { %v720_v45 = vpack.c.bf16 %v718_v43, %v716_v42 }
 0x30f   :  { %957 = vmatprep.mubr.bf16.mxu1 %v720_v45 }
 0x310   :  { %958 = vmatmul.mubr.bf16.vlgmr.msra.gmra.mrb[4].mxu1 %v719_v44 }
 0x3e3   :  { %v959_v54 = vpop.f32.mrb[4].mxu1 }
 0x3e4   :  { %v960_v55 = vadd.f32 %v959_v54, %v758_v52  ;;  %v961_v56 = vpop.f32.mrb[5].mxu1 }
 0x3e5   :  { %v962_v57 = vadd.f32 %v961_v56, %v762_v53  ;;  %v963_v58 = vpop.f32.mrb[6].mxu1 }
 0x3e6   :  { %v964_v59 = vadd.f32 %v963_v58, %v758_v52  ;;  %v965_v60 = vpop.f32.mrb[7].mxu1  ;;  %v968_v62 = vmax.f32 %v960_v55, 0.0 }
 0x3e7   :  { %v966_v61 = vadd.f32 %v965_v60, %v762_v53  ;;  %v969_v0 = vmax.f32 %v962_v57, 0.0 }
 0x3e8   :  { %v970_v63 = vmax.f32 %v964_v59, 0.0 }
 0x3e9   :  { %v971_v1 = vmax.f32 %v966_v61, 0.0 }
 0x3ea   :  { %v972_v2 = vpack.c.bf16 %v970_v63, %v968_v62 }
 0x3eb   :  { %v973_v3 = vpack.c.bf16 %v971_v1, %v969_v0 }
 0x3ed   :  { %1141 = vmatprep.mubr.bf16.mxu0 %v973_v3 }
 0x3ee   :  { %1142 = vmatmul.mubr.bf16.vlgmr.msra.gmra.mrb[8].mxu0 %v972_v2 }
 0x4c1   :  { %v1324_v4 = vpop.f32.mrb[8].mxu0 }
 0x4c2   :  { %v1325_v8 = vpop.f32.mrb[9].mxu0 }
 0x4c3   :  { %v1326_v5 = vadd.f32 %v1325_v8, %v1324_v4  ;;  %v1327_v10 = vpop.f32.mrb[10].mxu0 }
 0x4c4   :  { %v1328_v7 = vpop.f32.mrb[11].mxu0 }
 0x4c5   :  { %v1329_v9 = vadd.f32 %v1328_v7, %v1327_v10  ;;  %v1144_v11 = vadd.f32 %v1326_v5, %v1282_v6 }
 0x4c7   :  { %v1147_v12 = vadd.f32 %v1329_v9, %v1282_v6 }
 0x4c9   :  { %v1306_v13 = vpack.c.bf16 %v1147_v12, %v1144_v11 }
 0x4cb   :  { %1307 = vst [vmem:[#allocation13] sm:$0xff] %v1306_v13  }
 0x4cc   :  { %1650 = shalt.err (!%p1647_p10)
}
 0x4cd   :  { %s1651_s10 = scalar_lea.hbm %s1907_s11, 128 }
 0x4ce   :  { %p1652_p11 = scmp.ne.s32.totalorder %s1907_s11, %s1651_s10  ;;  %p1655_p12 = scmp.lt.u32.totalorder %s1651_s10, %s1907_s11 }
 0x4d0   :  { %p1657_p13 = pnand %p1655_p12, %p1652_p11 }
 0x4d2   :  { %1660 = shalt.err (!%p1657_p13)
}
 0x4d3   :  { %1171 = dma.vmem_to_hbm [thread:$0]  %s1166_s19, 128, %s1907_s11, [#allocation4], %s1679_s7, %s1679_s7, %s1680_s29  }
 0x4d4   :  { %1669 = dma.done.wait [#allocation4], 128  }
 0x4d5   :  { %1670 = vsyncadd [#allocation4], 4294967168 }
 0x4d6   :  { %1175 = vsyncpa [#allocation3], 1 }
 0x4d7   :  { %1176 = vsyncpa [#allocation6], 1 }
 0x4d8   :  { %1177 = vsyncpa [#allocation9], 1 }
 0x4d9   :  { %1178 = vsyncpa [#allocation12], 1 }
 0x4da   :  { %1179 = vsyncpa [#allocation4], 1 }

</bundles_post_ra>
